<compile_context>
chip_gen: v7x
topology: tpu7x:2x2x1
jax: 0.10.0
libtpu: 0.0.40
codegen_flags: <defaults>
</compile_context>

<pallas_src>
import jax
import jax.numpy as jnp
from jax.experimental import pallas as pl
from jax.experimental.pallas import tpu as pltpu


def _ste_sign_kernel(x_ref, o_ref):
    x = x_ref[...]
    one = jnp.ones_like(x)
    # +1 where x >= 0, -1 where x < 0, passthrough otherwise (NaN) -- matches the
    # PyTorch in-place masked assignments exactly.
    o_ref[...] = jnp.where(x >= 0, one, jnp.where(x < 0, -one, x))


def _round_up(a: int, m: int) -> int:
    return -(-a // m) * m


def _default_block_bytes() -> int:
    """Per-generation streaming block size; block * 2 arrays * 2 pipeline buffers
    stays under the default scoped-VMEM limit of each generation."""
    try:
        kind = jax.devices()[0].device_kind.lower()
    except Exception:
        return 2 << 20
    if "v7" in kind:
        return 6 << 20   # 24 MiB total; 64 MiB physical / 32 MiB scoped default
    if "v6" in kind:
        return 4 << 20   # 16 MiB total; 32 MiB scoped default
    return 3 << 20       # 12 MiB total; safe under v5e's 16 MiB scoped default


def _choose_lane_width(shape, n, itemsize, sub_align, block_bytes):
    """Pick C so that (n // C, C) is a free row-major view with max vreg occupancy."""
    cands = set()
    for w in (128, 256, 512, 1024, 2048, 4096, 8192):
        if n % w == 0:
            cands.add(w)
    p = 1
    for d in reversed(shape):            # trailing-dim products: always a free reshape
        p *= int(d)
        if p > 0:
            cands.add(p)
    cands.add(n)
    best_c, best_score = None, -1.0
    for c in sorted(cands):
        if c <= 0 or n % c != 0:
            continue
        rows = n // c
        min_rows = rows if rows < sub_align else sub_align   # smallest legal block rows
        if min_rows * c * itemsize > block_bytes:
            continue                                         # this view cannot be tiled
        score = (c / float(_round_up(c, 128))) * (rows / float(_round_up(rows, sub_align)))
        if score > best_score or (score == best_score and c > best_c):
            best_score, best_c = score, c
    return best_c


def _launch(x2d, sub_align, itemsize, block_bytes):
    rows, C = x2d.shape
    max_tr = max(sub_align,
                 (block_bytes // max(1, C * itemsize)) // sub_align * sub_align)
    if rows <= max_tr:
        # Whole row axis fits in one block: split into up to 8 sublane-aligned
        # steps so both v7x TensorCores get work and step DMAs overlap.
        tr = rows
        for k in (8, 7, 6, 5, 4, 3, 2):
            if rows % k == 0 and (rows // k) % sub_align == 0:
                tr = rows // k
                break
        grid = rows // tr
    else:
        tr = max_tr
        grid = pl.cdiv(rows, tr)         # last block may be partial: OOB writes dropped
    return pl.pallas_call(
        _ste_sign_kernel,
        out_shape=jax.ShapeDtypeStruct((rows, C), x2d.dtype),
        grid_spec=pltpu.PrefetchScalarGridSpec(
            num_scalar_prefetch=0,
            grid=(grid,),
            in_specs=[pl.BlockSpec((tr, C), lambda i: (i, 0))],
            out_specs=pl.BlockSpec((tr, C), lambda i: (i, 0)),
        ),
        compiler_params=pltpu.CompilerParams(
            dimension_semantics=("parallel",),
        ),
    )(x2d)


def ste_function(x: jax.Array, *, target_block_bytes=None) -> jax.Array:
    """Forward pass of STEFunction: elementwise sign with sign(0)=+1, NaN passthrough."""
    orig_shape = x.shape
    n = x.size
    if n == 0:
        return x

    itemsize = jnp.dtype(x.dtype).itemsize
    pack = max(1, 4 // itemsize)         # sub-32-bit dtypes pack along sublanes
    sub_align = 8 * pack                 # 8 (f32), 16 (bf16), 32 (int8/fp8)
    block_bytes = target_block_bytes or _default_block_bytes()

    C = _choose_lane_width(orig_shape, n, itemsize, sub_align, block_bytes)
    if C is not None:
        # Zero-copy path: row-major reshape in and out is pure metadata.
        out2d = _launch(x.reshape(n // C, C), sub_align, itemsize, block_bytes)
        return out2d.reshape(orig_shape)

    # Last-resort fallback: enormous, non-128-divisible trailing dims only.
    # TODO(synk): a manual-DMA kernel over the raw flat HBM buffer would make this
    # copy-free too, but the shape class is vanishingly rare for activations.
    W = 128 * sub_align
    rows = _round_up(n, W) // W
    flat = jnp.pad(jnp.ravel(x), (0, rows * W - n))
    out2d = _launch(flat.reshape(rows, W), sub_align, itemsize, block_bytes)
    return out2d.reshape(-1)[:n].reshape(orig_shape)


if __name__ == "__main__":
    key = jax.random.PRNGKey(0)

    # Primary test: small NCHW-shaped input (typical conv activations) — exercises
    # the aligned zero-copy path with full (8, 256) vreg occupancy.
    x = jax.random.normal(key, (2, 4, 16, 16), dtype=jnp.float32)
    out = jax.block_until_ready(ste_function(x))
    ref = jnp.where(x >= 0, 1.0, -1.0).astype(x.dtype)
    assert out.shape == x.shape
    assert out.dtype == x.dtype
    assert bool(jnp.all(out == ref))

    # Secondary test: ragged element count — exercises the copy-free trailing-dim
    # view (no jnp.pad, no post-slice).
    x2 = jax.random.normal(jax.random.PRNGKey(1), (3, 5, 7), dtype=jnp.float32)
    out2 = jax.block_until_ready(ste_function(x2))
    ref2 = jnp.where(x2 >= 0, 1.0, -1.0).astype(x2.dtype)
    assert out2.shape == x2.shape
    assert bool(jnp.all(out2 == ref2))

    # TODO(synk): backward (hardtanh of grad_output) is an autograd rule, not part
    # of the forward pass, and is not implemented here.
    print("KERNEL_OK")
</pallas_src>

<mosaic_0001>
module attributes {stable_mosaic.version = 11 : i64} {
  func.func @_ste_sign_kernel(%arg0: i32, %arg1: memref<8x256xf32, #tpu.memory_space<vmem>>, %arg2: memref<8x256xf32, #tpu.memory_space<vmem>>) attributes {dimension_semantics = [#tpu.dimension_semantics<parallel>], iteration_bounds = array<i64: 1>, scalar_prefetch = 0 : i64, scratch_operands = 0 : i64, tpu.core_type = #tpu.core_type<tc>, window_params = [{transform_indices = @transform_0, window_bounds = array<i64: 8, 256>}, {transform_indices = @transform_1, window_bounds = array<i64: 8, 256>}]} {
    %c0 = arith.constant 0 : index
    %c0_0 = arith.constant 0 : index
    %0 = vector.load %arg1[%c0, %c0_0] : memref<8x256xf32, #tpu.memory_space<vmem>>, vector<8x256xf32>
    %cst = arith.constant 1.000000e+00 : f32
    %1 = vector.broadcast %cst : f32 to vector<8x256xf32>
    %cst_1 = arith.constant 0.000000e+00 : f32
    %2 = vector.broadcast %cst_1 : f32 to vector<8x256xf32>
    %3 = arith.cmpf oge, %0, %2 : vector<8x256xf32>
    %cst_2 = arith.constant 0.000000e+00 : f32
    %4 = vector.broadcast %cst_2 : f32 to vector<8x256xf32>
    %5 = arith.cmpf olt, %0, %4 : vector<8x256xf32>
    %cst_3 = arith.constant 0.000000e+00 : f32
    %6 = vector.broadcast %cst_3 : f32 to vector<8x256xf32>
    %7 = arith.subf %6, %1 : vector<8x256xf32>
    %8 = arith.select %5, %7, %0 : vector<8x256xi1>, vector<8x256xf32>
    %9 = arith.select %3, %1, %8 : vector<8x256xi1>, vector<8x256xf32>
    %c0_4 = arith.constant 0 : index
    %c0_5 = arith.constant 0 : index
    %10 = vector.load %arg2[%c0_4, %c0_5] : memref<8x256xf32, #tpu.memory_space<vmem>>, vector<8x256xf32>
    tpu.vector_store %arg2[%c0_4, %c0_5], %9 {strides = array<i32>} : memref<8x256xf32, #tpu.memory_space<vmem>>, vector<8x256xf32>,
    return
  }
  func.func @transform_0(%arg0: i32) -> (i32, i32) {
    %c0_i32 = arith.constant 0 : i32
    %c0_i32_0 = arith.constant 0 : i32
    return %arg0, %c0_i32 : i32, i32
  }
  func.func @transform_1(%arg0: i32) -> (i32, i32) {
    %c0_i32 = arith.constant 0 : i32
    %c0_i32_0 = arith.constant 0 : i32
    return %arg0, %c0_i32 : i32, i32
  }
}

</mosaic_0001>

<bundles_post_ra>
// kernel: tpu_custom_call.1
= control target key start
LH: loop header
LB: loop body
LE: loop exit
PB: predicated region body
PF: predicated region fallthrough
CT: control target
= control target key end

     0   :  { %6 = vsyncpa [#allocation3], 0  ;;  %s134_s0 = inlined_call_operand.hbm [shape: f32[8,256], index: 0, kind: input, shape index: {}]   ;;  %s135_s1 = inlined_call_operand.hbm [shape: f32[8,256], index: 1, kind: output, shape index: {}]  }
   0x1   :  { %7 = vsyncpa [#allocation4], 0  ;;  %s98_s6 = smov [#allocation2]   ;;  %s50_s10 = scalar_lea.hbm %s134_s0, 256 }
   0x2   :  { %s14_s7 = sshll.u32 %s98_s6, 4  ;;  %p51_p0 = scmp.ne.s32.totalorder %s134_s0, %s50_s10  ;;  %s15_s7 = int_to_ptr.vmem [resolvable:$true] %s14_s7 }
   0x3   :  { %p54_p1 = scmp.lt.u32.totalorder %s50_s10, %s134_s0 }
   0x5   :  { %p56_p2 = pnand %p54_p1, %p51_p0 }
   0x7   :  { %59 = shalt.err (!%p56_p2)
}
   0x8   :  { %s60_s15 = scalar_lea.vmem %s15_s7, 256  ;;  %p65_p4 = scmp.lt.s32.totalorder %s15_s7, %s15_s7 }
   0x9   :  { %p61_p3 = scmp.ne.s32.totalorder %s15_s7, %s60_s15  ;;  %p66_p5 = scmp.lt.s32.totalorder %s60_s15, %s60_s15 }
   0xb   :  { %p67_p6 = por %p66_p5, %p65_p4 }
   0xd   :  { %p68_p7 = pnand %p67_p6, %p61_p3 }
   0xf   :  { %71 = shalt.err (!%p68_p7)
}
  0x10   :  { %17 = dma.hbm_to_vmem [thread:$0]  %s134_s0, 256, %s15_s7, [#allocation3]  }
  0x11   :  { %94 = dma.done.wait [#allocation3], 256  }
  0x12   :  { %95 = vsyncadd [#allocation3], 4294967040  ;;  %s99_s18 = smov [#allocation5]   ;;  %v21_v0 = vld [vmem:[#allocation2] sm:$0xff]  ;;  %v22_v1 = vld [vmem:[#allocation2 + $0x8] sm:$0xff] }
  0x13   :  { %s39_s19 = sshll.u32 %s99_s18, 4  ;;  %vm23_vm0 = vcmp.ge.f32.partialorder %v21_v0, 0.0  ;;  %vm25_vm1 = vcmp.lt.f32.partialorder %v21_v0, 0.0  ;;  %vm24_vm2 = vcmp.ge.f32.partialorder %v22_v1, 0.0  ;;  %vm26_vm3 = vcmp.lt.f32.partialorder %v22_v1, 0.0  ;;  %s40_s19 = int_to_ptr.vmem [resolvable:$true] %s39_s19 }
  0x14   :  { %v27_v2 = vsel %vm25_vm1, -1.0, %v21_v0  ;;  %v28_v3 = vsel %vm26_vm3, -1.0, %v22_v1  ;;  %s72_s20 = scalar_lea.vmem %s40_s19, 256  ;;  %p77_p9 = scmp.lt.s32.totalorder %s40_s19, %s40_s19 }
  0x15   :  { %v29_v4 = vsel %vm23_vm0, 1.0, %v27_v2  ;;  %v30_v5 = vsel %vm24_vm2, 1.0, %v28_v3  ;;  %p73_p8 = scmp.ne.s32.totalorder %s40_s19, %s72_s20  ;;  %p78_p10 = scmp.lt.s32.totalorder %s72_s20, %s72_s20 }
  0x16   :  { %31 = vst [vmem:[#allocation5] sm:$0xff] %v29_v4  ;;  %32 = vst [vmem:[#allocation5 + $0x8] sm:$0xff] %v30_v5 }
  0x17   :  { %p79_p11 = por %p78_p10, %p77_p9 }
  0x19   :  { %p80_p12 = pnand %p79_p11, %p73_p8 }
  0x1b   :  { %83 = shalt.err (!%p80_p12)
}
  0x1c   :  { %s84_s22 = scalar_lea.hbm %s135_s1, 256 }
  0x1d   :  { %p85_p13 = scmp.ne.s32.totalorder %s135_s1, %s84_s22  ;;  %p88_p0 = scmp.lt.u32.totalorder %s84_s22, %s135_s1 }
  0x1f   :  { %p90_p1 = pnand %p88_p0, %p85_p13 }
  0x21   :  { %93 = shalt.err (!%p90_p1)
}
  0x22   :  { %42 = dma.vmem_to_hbm [thread:$0]  %s40_s19, 256, %s135_s1, [#allocation4]  }
  0x23   :  { %96 = dma.done.wait [#allocation4], 256  }
  0x24   :  { %97 = vsyncadd [#allocation4], 4294967040 }
  0x25   :  { %46 = vsyncpa [#allocation3], 1 }
  0x26   :  { %47 = vsyncpa [#allocation4], 1 }

</bundles_post_ra>
